<compile_context>
chip_gen: v5e
topology: v5e:2x2
jax: 0.10.0
libtpu: 0.0.40
codegen_flags: <defaults>
</compile_context>

<pallas_src>
import functools
import math

import jax
import jax.numpy as jnp
from jax import lax
from jax.experimental import pallas as pl
from jax.experimental.pallas import tpu as pltpu

_LANES = 128


# ---------------------------------------------------------------------------
# Pallas kernel: squared distance -> UMAP cross entropy -> partial sum / part
# ---------------------------------------------------------------------------
def _umap_loss_kernel(to_ref, frm_ref, part_ref, acc_ref, *,
                      log_a, b, repulsion, log_inv_eps,
                      n_pos, n_total, tiles_per_part, n_feat):
    p = pl.program_id(0)          # parallel part (one per TensorCore on v7x)
    t = pl.program_id(1)          # reduction tile within the part

    @pl.when(t == 0)
    def _init():
        acc_ref[...] = jnp.zeros_like(acc_ref)

    # Per-feature squared-distance accumulation: every intermediate is
    # (R, 128); no (d, R, 128) diff temp is materialized in VMEM.
    sq = None
    for f in range(n_feat):
        dfeat = to_ref[f].astype(jnp.float32) - frm_ref[f].astype(jnp.float32)
        dfeat = dfeat * dfeat
        sq = dfeat if sq is None else sq + dfeat

    # a * dist^(2b) = a * sq^b  ->  log_t = b*log(sq) + log(a)
    log_sq = jnp.log(sq)                         # EUP #1 (sq=0 -> -inf, handled)
    log_t = b * log_sq + log_a

    # Stable shared softplus (no overflow, no cancellation):
    #   attraction (pre-clamp) = -log(prob)     = log(1+t)         = softplus( log_t)
    #   repellant  (pre-clamp) = -log(1 - prob) = log(1+t) - log_t = softplus(-log_t)
    #   softplus(+-x) = max(+-x, 0) + log(1 + exp(-|x|));  exp arg <= 0, so the
    #   log argument lies in (1, 2] and plain log matches log1p accuracy here.
    abs_lt = jnp.abs(log_t)
    shared = jnp.log(1.0 + jnp.exp(-abs_lt))     # EUP #2, #3
    attraction = jnp.minimum(jnp.maximum(log_t, 0.0) + shared, log_inv_eps)
    repellant = jnp.minimum(jnp.maximum(-log_t, 0.0) + shared,
                            log_inv_eps) * repulsion

    shape = sq.shape
    tile_elems = shape[0] * shape[1]
    base = (p * tiles_per_part + t) * tile_elems      # global flat pair offset

    # Tile-granular branching: the n_pos and n_total boundaries each hit at
    # most one tile, so interior tiles skip the per-element iota/select work.
    all_attr = base + tile_elems <= n_pos
    all_rep = jnp.logical_and(base >= n_pos, base + tile_elems <= n_total)
    is_mixed = jnp.logical_not(jnp.logical_or(all_attr, all_rep))

    @pl.when(all_attr)
    def _attr_only():
        acc_ref[...] += attraction

    @pl.when(all_rep)
    def _rep_only():
        acc_ref[...] += repellant

    @pl.when(is_mixed)
    def _mixed():
        idx = (base
               + lax.broadcasted_iota(jnp.int32, shape, 0) * shape[1]
               + lax.broadcasted_iota(jnp.int32, shape, 1))
        ce = jnp.where(idx < n_pos, attraction, repellant)
        acc_ref[...] += jnp.where(idx < n_total, ce, 0.0)

    @pl.when(t == pl.num_programs(1) - 1)
    def _finalize():
        s = jnp.sum(acc_ref[...], axis=0, keepdims=True)   # (1, 128)
        s = jnp.sum(s, axis=1, keepdims=True)               # (1, 1)
        part_ref[0] = jnp.broadcast_to(s, part_ref.shape[1:])


# ---------------------------------------------------------------------------
# Wrapper: build pair indices, gather lane-dense inputs, call the kernel
# ---------------------------------------------------------------------------
def parametric_umap_loss(embed_to_from, perm_key, *, batch_size,
                         negative_sample_rate, a, b,
                         repulsion_strength=1.0, eps=1e-4,
                         rows_per_tile=1024):
    x = embed_to_from
    if x.dtype not in (jnp.bfloat16, jnp.float32):
        x = x.astype(jnp.float32)          # keep bf16 as bf16 (half DMA bytes)

    n_feat = x.shape[1] // 2               # torch.chunk(embed_to_from, 2, 1)
    n_pos = int(batch_size)
    nsr = int(negative_sample_rate)
    n_neg = n_pos * nsr
    n_total = n_pos + n_neg

    # --- tiling / padding (static python ints) -----------------------------
    itemsize = jnp.dtype(x.dtype).itemsize
    sub = 16 if itemsize == 2 else 8       # (16,128) bf16 / (8,128) f32 tiling

    def _round_up(v, m):
        return -(-v // m) * m

    rows_needed = _round_up(-(-n_total // _LANES), sub)
    rows_per_tile = max(sub, _round_up(int(rows_per_tile), sub))
    rows_per_tile = min(rows_per_tile, rows_needed)

    # Clamp the tile so (2 inputs x 2 pipeline buffers) + f32 accumulator stay
    # well inside the default scoped VMEM on every generation
    # (16 MiB v5e, 32 MiB v6e/v7x; v7x only has 64 MiB physical VMEM).
    try:
        vmem_cap = int(pltpu.get_tpu_info().vmem_capacity_bytes)
    except Exception:
        vmem_cap = 64 << 20
    vmem_budget = min(vmem_cap // 4, 12 << 20)
    bytes_per_row = 2 * 2 * n_feat * _LANES * itemsize + _LANES * 4
    rows_cap = max(sub, (vmem_budget // bytes_per_row) // sub * sub)
    rows_per_tile = min(rows_per_tile, rows_cap)

    tile_elems = rows_per_tile * _LANES
    n_tiles = -(-n_total // tile_elems)
    n_parts = 2 if n_tiles >= 2 else 1     # one part per TensorCore on v7x
    tiles_per_part = -(-n_tiles // n_parts)
    n_tiles = n_parts * tiles_per_part
    n_pad = n_tiles * tile_elems
    assert n_pad + tile_elems < 2 ** 31, "int32 flat pair index would overflow"

    # --- pair indices; gather straight into the lane-dense kernel layout ---
    # Replaces repeat_interleave / permutation gather / concat / transpose /
    # pad over the big (n_total, d) arrays with one gather from the tiny
    # (d, batch) source per kernel input.
    perm = jax.random.permutation(perm_key, n_neg)          # torch.randperm
    pos_idx = jnp.arange(n_pos, dtype=jnp.int32)
    neg_to_idx = jnp.arange(n_neg, dtype=jnp.int32) // nsr   # repeat_interleave
    neg_from_idx = (perm // nsr).astype(jnp.int32)           # repeat[perm]
    pad = n_pad - n_total
    to_idx = jnp.pad(jnp.concatenate([pos_idx, neg_to_idx]), (0, pad))
    from_idx = jnp.pad(jnp.concatenate([pos_idx, neg_from_idx]), (0, pad))

    to_small = jnp.transpose(x[:, :n_feat])                  # (d, batch): tiny
    from_small = jnp.transpose(x[:, n_feat:])

    def gather_lane_dense(src, idx):
        return jnp.take(src, idx, axis=1).reshape(
            n_feat, n_pad // _LANES, _LANES)

    to_l = gather_lane_dense(to_small, to_idx)
    from_l = gather_lane_dense(from_small, from_idx)
    # TODO(synk): fold this gather into the kernel itself (scalar-prefetched
    # indices + VMEM-resident (batch, d) embeddings) to drop the remaining
    # HBM materialization of the (n_pad, d) pair arrays.

    kernel = functools.partial(
        _umap_loss_kernel,
        log_a=float(math.log(a)), b=float(b),
        repulsion=float(repulsion_strength),
        log_inv_eps=float(-math.log(eps)),
        n_pos=n_pos, n_total=n_total,
        tiles_per_part=tiles_per_part, n_feat=n_feat)

    parts = pl.pallas_call(
        kernel,
        out_shape=jax.ShapeDtypeStruct((n_parts, 8, _LANES), jnp.float32),
        grid=(n_parts, tiles_per_part),
        in_specs=[
            pl.BlockSpec((n_feat, rows_per_tile, _LANES),
                         lambda p, t: (0, p * tiles_per_part + t, 0)),
            pl.BlockSpec((n_feat, rows_per_tile, _LANES),
                         lambda p, t: (0, p * tiles_per_part + t, 0)),
        ],
        out_specs=pl.BlockSpec((1, 8, _LANES), lambda p, t: (p, 0, 0)),
        scratch_shapes=[pltpu.VMEM((rows_per_tile, _LANES), jnp.float32)],
        compiler_params=pltpu.CompilerParams(
            dimension_semantics=("parallel", "arbitrary")),
    )(to_l, from_l)

    return jnp.sum(parts[:, 0, 0]) / n_total


# ---------------------------------------------------------------------------
# Pure-JAX reference (mirrors the PyTorch forward) for correctness checking
# ---------------------------------------------------------------------------
def _reference_loss(embed_to_from, perm_key, *, batch_size,
                    negative_sample_rate, a, b,
                    repulsion_strength=1.0, eps=1e-4):
    x = embed_to_from.astype(jnp.float32)
    embedding_to, embedding_from = jnp.split(x, 2, axis=1)
    embedding_neg_to = jnp.repeat(embedding_to, negative_sample_rate, axis=0)
    repeat_neg = jnp.repeat(embedding_from, negative_sample_rate, axis=0)
    perm = jax.random.permutation(perm_key, repeat_neg.shape[0])
    embedding_neg_from = repeat_neg[perm]

    d_pos = jnp.linalg.norm(embedding_to - embedding_from, axis=1)
    d_neg = jnp.linalg.norm(embedding_neg_to - embedding_neg_from, axis=1)
    dist = jnp.concatenate([d_pos, d_neg], axis=0)
    prob_dist = 1.0 / (1.0 + a * dist ** (2.0 * b))
    prob_graph = jnp.concatenate(
        [jnp.ones(batch_size),
         jnp.zeros(batch_size * negative_sample_rate)], axis=0)
    attraction = -prob_graph * jnp.log(jnp.clip(prob_dist, eps, 1.0))
    repellant = -(1.0 - prob_graph) * jnp.log(
        jnp.clip(1.0 - prob_dist, eps, 1.0)) * repulsion_strength
    return jnp.mean(attraction + repellant)


if __name__ == "__main__":
    _a, _b = 1.577, 0.8951          # typical UMAP a/b fit values
    repulsion_strength = 1.0
    embed_dim = 2                   # standard UMAP 2-D embedding

    key = jax.random.PRNGKey(0)

    configs = [
        # (batch, nsr, rows_per_tile) -- small rows_per_tile values only
        # exist to exercise the multi-tile / 2-part / fast-branch paths.
        (64, 5, 1024),    # single mixed tile (pos/total boundaries + padding)
        (256, 9, 8),      # 2 parts x 2 tiles: mixed + interior + padded tiles
        (2048, 2, 8),     # exercises the all-attraction / all-repellant paths
    ]
    for batch_size, nsr, rpt in configs:
        key, k_data, k_perm = jax.random.split(key, 3)
        embed_to_from = jax.random.normal(
            k_data, (batch_size, 2 * embed_dim), dtype=jnp.float32)

        loss = parametric_umap_loss(
            embed_to_from, k_perm,
            batch_size=batch_size, negative_sample_rate=nsr,
            a=_a, b=_b, repulsion_strength=repulsion_strength,
            rows_per_tile=rpt)
        loss = jax.block_until_ready(loss)

        ref = _reference_loss(
            embed_to_from, k_perm,
            batch_size=batch_size, negative_sample_rate=nsr,
            a=_a, b=_b, repulsion_strength=repulsion_strength)
        ref = jax.block_until_ready(ref)

        assert jnp.abs(loss - ref) < 2e-4, (batch_size, nsr, loss, ref)

    print("KERNEL_OK")
</pallas_src>

<mosaic_0001>
module attributes {stable_mosaic.version = 11 : i64} {
  func.func @_umap_loss_kernel(%arg0: i32, %arg1: i32, %arg2: memref<2x8x128xf32, #tpu.memory_space<vmem>>, %arg3: memref<2x8x128xf32, #tpu.memory_space<vmem>>, %arg4: memref<1x8x128xf32, #tpu.memory_space<vmem>>, %arg5: memref<8x128xf32, #tpu.memory_space<vmem>>) attributes {dimension_semantics = [#tpu.dimension_semantics<parallel>, #tpu.dimension_semantics<arbitrary>], iteration_bounds = array<i64: 1, 1>, scalar_prefetch = 0 : i64, scratch_operands = 1 : i64, tpu.core_type = #tpu.core_type<tc>, window_params = [{transform_indices = @transform_0, window_bounds = array<i64: 2, 8, 128>}, {transform_indices = @transform_1, window_bounds = array<i64: 2, 8, 128>}, {transform_indices = @transform_2, window_bounds = array<i64: 1, 8, 128>}]} {
    %c0_i32 = arith.constant 0 : i32
    %0 = arith.cmpi eq, %arg1, %c0_i32 : i32
    %1 = arith.extui %0 : i1 to i32
    %c0_i32_0 = arith.constant 0 : i32
    %2 = arith.cmpi ne, %1, %c0_i32_0 : i32
    scf.if %2 {
      %cst_28 = arith.constant 0.000000e+00 : f32
      %62 = vector.broadcast %cst_28 : f32 to vector<8x128xf32>
      %c0_29 = arith.constant 0 : index
      %c0_30 = arith.constant 0 : index
      %63 = vector.load %arg5[%c0_29, %c0_30] : memref<8x128xf32, #tpu.memory_space<vmem>>, vector<8x128xf32>
      tpu.vector_store %arg5[%c0_29, %c0_30], %62 {strides = array<i32>} : memref<8x128xf32, #tpu.memory_space<vmem>>, vector<8x128xf32>,
    } else {
    }
    %c0 = arith.constant 0 : index
    %c0_1 = arith.constant 0 : index
    %c0_2 = arith.constant 0 : index
    %3 = vector.load %arg2[%c0, %c0_1, %c0_2] : memref<2x8x128xf32, #tpu.memory_space<vmem>>, vector<1x8x128xf32>
    %4 = vector.shape_cast %3 : vector<1x8x128xf32> to vector<8x128xf32>
    %c0_3 = arith.constant 0 : index
    %c0_4 = arith.constant 0 : index
    %c0_5 = arith.constant 0 : index
    %5 = vector.load %arg3[%c0_3, %c0_4, %c0_5] : memref<2x8x128xf32, #tpu.memory_space<vmem>>, vector<1x8x128xf32>
    %6 = vector.shape_cast %5 : vector<1x8x128xf32> to vector<8x128xf32>
    %7 = arith.subf %4, %6 : vector<8x128xf32>
    %8 = arith.mulf %7, %7 : vector<8x128xf32>
    %c1 = arith.constant 1 : index
    %c0_6 = arith.constant 0 : index
    %c0_7 = arith.constant 0 : index
    %9 = vector.load %arg2[%c1, %c0_6, %c0_7] : memref<2x8x128xf32, #tpu.memory_space<vmem>>, vector<1x8x128xf32>
    %10 = vector.shape_cast %9 : vector<1x8x128xf32> to vector<8x128xf32>
    %c1_8 = arith.constant 1 : index
    %c0_9 = arith.constant 0 : index
    %c0_10 = arith.constant 0 : index
    %11 = vector.load %arg3[%c1_8, %c0_9, %c0_10] : memref<2x8x128xf32, #tpu.memory_space<vmem>>, vector<1x8x128xf32>
    %12 = vector.shape_cast %11 : vector<1x8x128xf32> to vector<8x128xf32>
    %13 = arith.subf %10, %12 : vector<8x128xf32>
    %14 = arith.mulf %13, %13 : vector<8x128xf32>
    %15 = arith.addf %8, %14 : vector<8x128xf32>
    %16 = math.log %15 : vector<8x128xf32>
    %cst = arith.constant 0.895099997 : f32
    %17 = vector.broadcast %cst : f32 to vector<8x128xf32>
    %18 = arith.mulf %17, %16 : vector<8x128xf32>
    %cst_11 = arith.constant 0.455524296 : f32
    %19 = vector.broadcast %cst_11 : f32 to vector<8x128xf32>
    %20 = arith.addf %18, %19 : vector<8x128xf32>
    %21 = math.absf %20 : vector<8x128xf32>
    %cst_12 = arith.constant 0.000000e+00 : f32
    %22 = vector.broadcast %cst_12 : f32 to vector<8x128xf32>
    %23 = arith.subf %22, %21 : vector<8x128xf32>
    %24 = math.exp %23 : vector<8x128xf32>
    %cst_13 = arith.constant 1.000000e+00 : f32
    %25 = vector.broadcast %cst_13 : f32 to vector<8x128xf32>
    %26 = arith.addf %25, %24 : vector<8x128xf32>
    %27 = math.log %26 : vector<8x128xf32>
    %cst_14 = arith.constant 0.000000e+00 : f32
    %28 = vector.broadcast %cst_14 : f32 to vector<8x128xf32>
    %29 = arith.maximumf %20, %28 : vector<8x128xf32>
    %30 = arith.addf %29, %27 : vector<8x128xf32>
    %cst_15 = arith.constant 9.21034049 : f32
    %31 = vector.broadcast %cst_15 : f32 to vector<8x128xf32>
    %32 = arith.minimumf %30, %31 : vector<8x128xf32>
    %cst_16 = arith.constant 0.000000e+00 : f32
    %33 = vector.broadcast %cst_16 : f32 to vector<8x128xf32>
    %34 = arith.subf %33, %20 : vector<8x128xf32>
    %cst_17 = arith.constant 0.000000e+00 : f32
    %35 = vector.broadcast %cst_17 : f32 to vector<8x128xf32>
    %36 = arith.maximumf %34, %35 : vector<8x128xf32>
    %37 = arith.addf %36, %27 : vector<8x128xf32>
    %cst_18 = arith.constant 9.21034049 : f32
    %38 = vector.broadcast %cst_18 : f32 to vector<8x128xf32>
    %39 = arith.minimumf %37, %38 : vector<8x128xf32>
    %cst_19 = arith.constant 1.000000e+00 : f32
    %40 = vector.broadcast %cst_19 : f32 to vector<8x128xf32>
    %41 = arith.mulf %39, %40 : vector<8x128xf32>
    %c1_i32 = arith.constant 1 : i32
    %42 = arith.muli %arg0, %c1_i32 : i32
    %43 = arith.addi %42, %arg1 : i32
    %c1024_i32 = arith.constant 1024 : i32
    %44 = arith.muli %43, %c1024_i32 : i32
    %c1024_i32_20 = arith.constant 1024 : i32
    %45 = arith.addi %44, %c1024_i32_20 : i32
    %c64_i32 = arith.constant 64 : i32
    %46 = arith.cmpi sle, %45, %c64_i32 : i32
    %c64_i32_21 = arith.constant 64 : i32
    %47 = arith.cmpi sge, %44, %c64_i32_21 : i32
    %c1024_i32_22 = arith.constant 1024 : i32
    %48 = arith.addi %44, %c1024_i32_22 : i32
    %c384_i32 = arith.constant 384 : i32
    %49 = arith.cmpi sle, %48, %c384_i32 : i32
    %50 = arith.andi %47, %49 : i1
    %51 = arith.ori %46, %50 : i1
    %true = arith.constant true
    %52 = arith.xori %51, %true : i1
    %53 = arith.extui %46 : i1 to i32
    %c0_i32_23 = arith.constant 0 : i32
    %54 = arith.cmpi ne, %53, %c0_i32_23 : i32
    scf.if %54 {
      %c0_28 = arith.constant 0 : index
      %c0_29 = arith.constant 0 : index
      %62 = vector.load %arg5[%c0_28, %c0_29] : memref<8x128xf32, #tpu.memory_space<vmem>>, vector<8x128xf32>
      %63 = arith.addf %62, %32 : vector<8x128xf32>
      %c0_30 = arith.constant 0 : index
      %c0_31 = arith.constant 0 : index
      %64 = vector.load %arg5[%c0_30, %c0_31] : memref<8x128xf32, #tpu.memory_space<vmem>>, vector<8x128xf32>
      tpu.vector_store %arg5[%c0_30, %c0_31], %63 {strides = array<i32>} : memref<8x128xf32, #tpu.memory_space<vmem>>, vector<8x128xf32>,
    } else {
    }
    %55 = arith.extui %50 : i1 to i32
    %c0_i32_24 = arith.constant 0 : i32
    %56 = arith.cmpi ne, %55, %c0_i32_24 : i32
    scf.if %56 {
      %c0_28 = arith.constant 0 : index
      %c0_29 = arith.constant 0 : index
      %62 = vector.load %arg5[%c0_28, %c0_29] : memref<8x128xf32, #tpu.memory_space<vmem>>, vector<8x128xf32>
      %63 = arith.addf %62, %41 : vector<8x128xf32>
      %c0_30 = arith.constant 0 : index
      %c0_31 = arith.constant 0 : index
      %64 = vector.load %arg5[%c0_30, %c0_31] : memref<8x128xf32, #tpu.memory_space<vmem>>, vector<8x128xf32>
      tpu.vector_store %arg5[%c0_30, %c0_31], %63 {strides = array<i32>} : memref<8x128xf32, #tpu.memory_space<vmem>>, vector<8x128xf32>,
    } else {
    }
    %57 = arith.extui %52 : i1 to i32
    %c0_i32_25 = arith.constant 0 : i32
    %58 = arith.cmpi ne, %57, %c0_i32_25 : i32
    scf.if %58 {
      %62 = tpu.iota {dimensions = array<i32: 0>} : vector<8x128xi32>
      %c128_i32 = arith.constant 128 : i32
      %63 = vector.broadcast %c128_i32 : i32 to vector<8x128xi32>
      %64 = arith.muli %62, %63 : vector<8x128xi32>
      %65 = vector.broadcast %44 : i32 to vector<8x128xi32>
      %66 = arith.addi %65, %64 : vector<8x128xi32>
      %67 = tpu.iota {dimensions = array<i32: 1>} : vector<8x128xi32>
      %68 = arith.addi %66, %67 : vector<8x128xi32>
      %c64_i32_28 = arith.constant 64 : i32
      %69 = vector.broadcast %c64_i32_28 : i32 to vector<8x128xi32>
      %70 = arith.cmpi slt, %68, %69 : vector<8x128xi32>
      %71 = arith.select %70, %32, %41 : vector<8x128xi1>, vector<8x128xf32>
      %c0_29 = arith.constant 0 : index
      %c0_30 = arith.constant 0 : index
      %72 = vector.load %arg5[%c0_29, %c0_30] : memref<8x128xf32, #tpu.memory_space<vmem>>, vector<8x128xf32>
      %c384_i32_31 = arith.constant 384 : i32
      %73 = vector.broadcast %c384_i32_31 : i32 to vector<8x128xi32>
      %74 = arith.cmpi slt, %68, %73 : vector<8x128xi32>
      %cst_32 = arith.constant 0.000000e+00 : f32
      %75 = vector.broadcast %cst_32 : f32 to vector<8x128xf32>
      %76 = arith.select %74, %71, %75 : vector<8x128xi1>, vector<8x128xf32>
      %77 = arith.addf %72, %76 : vector<8x128xf32>
      %c0_33 = arith.constant 0 : index
      %c0_34 = arith.constant 0 : index
      %78 = vector.load %arg5[%c0_33, %c0_34] : memref<8x128xf32, #tpu.memory_space<vmem>>, vector<8x128xf32>
      tpu.vector_store %arg5[%c0_33, %c0_34], %77 {strides = array<i32>} : memref<8x128xf32, #tpu.memory_space<vmem>>, vector<8x128xf32>,
    } else {
    }
    %c0_i32_26 = arith.constant 0 : i32
    %59 = arith.cmpi eq, %arg1, %c0_i32_26 : i32
    %60 = arith.extui %59 : i1 to i32
    %c0_i32_27 = arith.constant 0 : i32
    %61 = arith.cmpi ne, %60, %c0_i32_27 : i32
    scf.if %61 {
      %c0_28 = arith.constant 0 : index
      %c0_29 = arith.constant 0 : index
      %62 = vector.load %arg5[%c0_28, %c0_29] : memref<8x128xf32, #tpu.memory_space<vmem>>, vector<8x128xf32>
      %cst_30 = arith.constant dense<0.000000e+00> : vector<128xf32>
      %63 = vector.multi_reduction <add>, %62, %cst_30 [0] : vector<8x128xf32> to vector<128xf32>
      %64 = vector.shape_cast %63 : vector<128xf32> to vector<1x128xf32>
      %cst_31 = arith.constant dense<0.000000e+00> : vector<1xf32>
      %65 = vector.multi_reduction <add>, %64, %cst_31 [1] : vector<1x128xf32> to vector<1xf32>
      %66 = vector.shape_cast %65 : vector<1xf32> to vector<1x1xf32>
      %67 = vector.shape_cast %66 : vector<1x1xf32> to vector<1x1xf32>
      %68 = vector.broadcast %67 : vector<1x1xf32> to vector<8x128xf32>
      %c0_32 = arith.constant 0 : index
      %c0_33 = arith.constant 0 : index
      %c0_34 = arith.constant 0 : index
      %69 = vector.load %arg4[%c0_32, %c0_33, %c0_34] : memref<1x8x128xf32, #tpu.memory_space<vmem>>, vector<1x8x128xf32>
      %70 = vector.shape_cast %69 : vector<1x8x128xf32> to vector<8x128xf32>
      %71 = vector.shape_cast %68 : vector<8x128xf32> to vector<1x8x128xf32>
      tpu.vector_store %arg4[%c0_32, %c0_33, %c0_34], %71 {strides = array<i32>} : memref<1x8x128xf32, #tpu.memory_space<vmem>>, vector<1x8x128xf32>,
    } else {
    }
    return
  }
  func.func @transform_0(%arg0: i32, %arg1: i32) -> (i32, i32, i32) {
    %c1_i32 = arith.constant 1 : i32
    %0 = arith.muli %arg0, %c1_i32 : i32
    %1 = arith.addi %0, %arg1 : i32
    %c0_i32 = arith.constant 0 : i32
    %c0_i32_0 = arith.constant 0 : i32
    %c0_i32_1 = arith.constant 0 : i32
    return %c0_i32, %1, %c0_i32_0 : i32, i32, i32
  }
  func.func @transform_1(%arg0: i32, %arg1: i32) -> (i32, i32, i32) {
    %c1_i32 = arith.constant 1 : i32
    %0 = arith.muli %arg0, %c1_i32 : i32
    %1 = arith.addi %0, %arg1 : i32
    %c0_i32 = arith.constant 0 : i32
    %c0_i32_0 = arith.constant 0 : i32
    %c0_i32_1 = arith.constant 0 : i32
    return %c0_i32, %1, %c0_i32_0 : i32, i32, i32
  }
  func.func @transform_2(%arg0: i32, %arg1: i32) -> (i32, i32, i32) {
    %c0_i32 = arith.constant 0 : i32
    %c0_i32_0 = arith.constant 0 : i32
    %c0_i32_1 = arith.constant 0 : i32
    return %arg0, %c0_i32, %c0_i32_0 : i32, i32, i32
  }
}

</mosaic_0001>

<bundles_post_ra>
// kernel: tpu_custom_call.1
= control target key start
LH: loop header
LB: loop body
LE: loop exit
PB: predicated region body
PF: predicated region fallthrough
CT: control target
= control target key end

     0   :  { %7 = vsyncpa [#allocation4], 0  ;;  %s273_s0 = inlined_call_operand.hbm [shape: f32[2,8,128], index: 0, kind: input, shape index: {}]   ;;  %s274_s1 = inlined_call_operand.hbm [shape: f32[2,8,128], index: 1, kind: input, shape index: {}]   ;;  %s275_s2 = inlined_call_operand.hbm [shape: f32[1,8,128], index: 2, kind: output, shape index: {}]  }
   0x1   :  { %8 = vsyncpa [#allocation7], 0 }
   0x2   :  { %9 = vsyncpa [#allocation5], 0  ;;  %s17_s11 = sshll.u32 %s273_s0, 4  ;;  %s244_s12 = smov [#allocation3]   ;;  %s18_s11 = int_to_ptr.hbm [resolvable:$true] %s17_s11 }
   0x3   :  { %s19_s13 = sshll.u32 %s244_s12, 4  ;;  %s33_s16 = sshll.u32 %s274_s1, 4  ;;  %s20_s13 = int_to_ptr.vmem [resolvable:$true] %s19_s13  ;;  %s34_s16 = int_to_ptr.hbm [resolvable:$true] %s33_s16 }
   0x4   :  { %s245_s17 = smov 128   ;;  %s246_s18 = smov 8  }
   0x5   :  { %25 = dma.hbm_to_vmem [thread:$0]  %s18_s11, 256, %s20_s13, [#allocation4], %s245_s17, %s245_s17, %s246_s18  }
   0x6   :  { %s247_s19 = smov [#allocation6]  }
   0x7   :  { %s35_s20 = sshll.u32 %s247_s19, 4  ;;  %s36_s20 = int_to_ptr.vmem [resolvable:$true] %s35_s20 }
   0x8   :  { %41 = dma.hbm_to_vmem [thread:$0]  %s34_s16, 256, %s36_s20, [#allocation7], %s245_s17, %s245_s17, %s246_s18  }
   0x9   :  { %238 = dma.done.wait [#allocation4], 256  }
   0xa   :  { %239 = vsyncadd [#allocation4], 4294967040 }
   0xb   :  { %240 = dma.done.wait [#allocation7], 256  }
   0xc   :  { %241 = vsyncadd [#allocation7], 4294967040  ;;  %v57_v0 = vld [vmem:[#allocation3] sm:$0xff]  ;;  %v58_v1 = vld [vmem:[#allocation6] sm:$0xff]  ;;  %v109_v16 = vlaneseq  ;;  %s248_s0 = smov [#allocation8]   ;;  %s144_s23 = sshll.u32 %s275_s2, 4  ;;  %s145_s23 = int_to_ptr.hbm [resolvable:$true] %s144_s23 }
   0xd   :  { %v62_v2 = vld [vmem:[#allocation3 + $0x8] sm:$0xff]  ;;  %v59_v3 = vsub.f32 %v57_v0, %v58_v1  ;;  %v64_v4 = vld [vmem:[#allocation6 + $0x8] sm:$0xff]  ;;  %s142_s1 = sshll.u32 %s248_s0, 4  ;;  %s143_s1 = int_to_ptr.vmem [resolvable:$true] %s142_s1 }
   0xe   :  { %v65_v5 = vsub.f32 %v62_v2, %v64_v4  ;;  %v110_v19 = vshrl.u32 %v109_v16, 7  ;;  %v115_v22 = vand.u32 127, %v109_v16 }
   0xf   :  { %v60_v6 = vmul.f32 %v59_v3, %v59_v3 }
  0x10   :  { %v66_v7 = vmul.f32 %v65_v5, %v65_v5  ;;  %v111_v21 = vmul.u32 128, %v110_v19 }
  0x12   :  { %v67_v8 = vadd.f32 %v66_v7, %v60_v6  ;;  %v116_v26 = vadd.s32 %v115_v22, %v111_v21 }
  0x14   :  { %160 = vlog2.f32 %v67_v8  ;;  %vm117_vm0 = vcmp.lt.s32.totalorder %v116_v26, 64  ;;  %vm120_vm1 = vcmp.lt.s32.totalorder %v116_v26, 384 }
  0x1a   :  { %v161_v9 = vpop.eup %160 }
  0x1b   :  { %v69_v10 = vmul.f32 0.6931472, %v161_v9 }
  0x1d   :  { %v70_v11 = vmul.f32 0.8951, %v69_v10 }
  0x1f   :  { %v71_v12 = vadd.f32 0.4555243, %v70_v11 }
  0x21   :  { %v72_v13 = vand.u32 2147483647, %v71_v12  ;;  %v82_v20 = vsub.f32 0.0, %v71_v12  ;;  %v79_v23 = vmax.f32 %v71_v12, 0.0 }
  0x23   :  { %v73_v14 = vsub.f32 0.0, %v72_v13  ;;  %v83_v24 = vmax.f32 %v82_v20, 0.0 }
  0x25   :  { %v74_v15 = vmul.f32 1.442695, %v73_v14 }
  0x27   :  { %162 = vpow2.f32 %v74_v15 }
  0x2d   :  { %v163_v17 = vpop.eup %162 }
  0x2e   :  { %v76_v18 = vadd.f32 1.0, %v163_v17 }
  0x30   :  { %164 = vlog2.f32 %v76_v18 }
  0x36   :  { %v165_v25 = vpop.eup %164 }
  0x37   :  { %v78_v27 = vmul.f32 0.6931472, %v165_v25 }
  0x39   :  { %v80_v28 = vadd.f32 %v79_v23, %v78_v27  ;;  %v84_v29 = vadd.f32 %v83_v24, %v78_v27 }
  0x3b   :  { %v81_v30 = vmin.f32 %v80_v28, 9.2103405  ;;  %v85_v31 = vmin.f32 %v84_v29, 9.2103405 }
  0x3d   :  { %v118_v32 = vsel %vm117_vm0, %v81_v30, %v85_v31 }
  0x3e   :  { %v121_v33 = vsel %vm120_vm1, %v118_v32, 0.0 }
  0x3f   :  { %v128_v34 = vrot.slane %v121_v33, 4 }
  0x41   :  { %v129_v35 = vadd.f32 %v128_v34, %v121_v33 }
  0x43   :  { %v130_v36 = vrot.slane %v129_v35, 2 }
  0x45   :  { %v131_v37 = vadd.f32 %v130_v36, %v129_v35 }
  0x47   :  { %v132_v38 = vrot.slane %v131_v37, 1 }
  0x49   :  { %v133_v39 = vadd.f32 %v132_v38, %v131_v37 }
  0x4b   :  { %134 = vadd.xlane.f32.xlu0 %v133_v39 }
  0xbe   :  { %v135_v40 = vpop.xlane.xlu0 %134 }
  0xbf   :  { %136 = vst [vmem:[#allocation8] sm:$0xff] %v135_v40 }
  0xc0   :  { %147 = dma.vmem_to_hbm [thread:$0]  %s143_s1, 128, %s145_s23, [#allocation5]  }
  0xc1   :  { %242 = dma.done.wait [#allocation5], 128  }
  0xc2   :  { %243 = vsyncadd [#allocation5], 4294967168 }
  0xc3   :  { %152 = vsyncpa [#allocation4], 1 }
  0xc4   :  { %153 = vsyncpa [#allocation7], 1 }
  0xc5   :  { %154 = vsyncpa [#allocation5], 1 }

</bundles_post_ra>
